<compile_context>
chip_gen: v7x
topology: tpu7x:2x2x1
jax: 0.10.0
libtpu: 0.0.40
codegen_flags: <defaults>
</compile_context>

<pallas_src>
import functools

import jax
import jax.numpy as jnp
from jax.experimental import pallas as pl
from jax.experimental.pallas import tpu as pltpu


def dsconv_kernel(xt_ref, xm_ref, xb_ref, dww_ref, dwb_ref, pww_ref, pwb_ref,
                  out_ref, *, W):
    # xt_ref : (1, W, C)       image row just above this H-tile (index clamped)
    # xm_ref : (1, ht*W, C)    the ht image rows of this H-tile, row-flattened
    # xb_ref : (1, W, C)       image row just below this H-tile (index clamped)
    # dww_ref: (9, 1, C)       depthwise 3x3 weights, tap-major (BN1 folded)
    # dwb_ref: (1, C)          depthwise bias (BN1 folded)
    # pww_ref: (C, Cop) bf16   pointwise weights (BN2 folded, Co zero-padded)
    # pwb_ref: (1, Cop) f32    pointwise bias    (BN2 folded, Co zero-padded)
    # out_ref: (1, ht*W, Cop)  lane-dense output block
    h = pl.program_id(1)
    n_h = pl.num_programs(1)
    C = xm_ref.shape[2]
    ht = xm_ref.shape[1] // W
    M = (ht + 2) * W

    # "Same" zero padding along H: the clamped halo rows are zeroed at the
    # image border by a scalar factor (no padded scratch, no full-tile zeroing).
    top = xt_ref[0] * jnp.where(h == 0, 0.0, 1.0)          # (W, C)
    bot = xb_ref[0] * jnp.where(h == n_h - 1, 0.0, 1.0)    # (W, C)
    xf = jnp.concatenate([top, xm_ref[0], bot], axis=0)    # (M, C)

    # "Same" zero padding along W: XLU rolls along the flattened row/sublane
    # axis + edge-column masks.  Wrap-around rows always land on a masked col.
    col = jax.lax.broadcasted_iota(jnp.int32, (M, 1), 0) % W
    xl = jnp.where(col == 0, 0.0, pltpu.roll(xf, 1, axis=0))        # x[., c-1]
    xr = jnp.where(col == W - 1, 0.0, pltpu.roll(xf, M - 1, axis=0))  # x[., c+1]
    bands = (xl, xf, xr)                                   # kernel col j = 0,1,2

    # Depthwise 3x3: 9 channel-vectorized MACs over row-band slices.  Slices
    # are along the sublane axis at multiples of W (aligned for W % 8 == 0).
    dww = dww_ref[...]                                     # (9, 1, C)
    # Init accumulator with bias + center tap (saves one full-tile zero pass).
    acc = dwb_ref[...] + xf[W:W + ht * W] * dww[4]         # (ht*W, C)
    for i in range(3):
        for j in range(3):
            if i == 1 and j == 1:
                continue
            acc = acc + bands[j][i * W:(i + ht) * W] * dww[3 * i + j]
    y = jnp.clip(acc, 0.0, 6.0)                            # ReLU6, (ht*W, C)

    # Pointwise 1x1: bf16 MXU matmul (full rate on v5e/v6e/v7x), f32 accumulate,
    # Cop (multiple of 128) on lanes -> unmasked lane-dense store.
    z = jnp.dot(y.astype(jnp.bfloat16), pww_ref[...],
                preferred_element_type=jnp.float32)        # (ht*W, Cop)
    out_ref[0] = z + pwb_ref[...]


def _round_up(v, m):
    return (v + m - 1) // m * m


def dsconv_pallas(x, dww, dwb, pww, pwb, *, ht=None):
    """x: (N, C, H, W) float32 (PyTorch NCHW).  Weights already BN-folded.

    dww: (9, 1, C) tap-major depthwise weights; dwb: (1, C);
    pww: (C, Co) pointwise weights; pwb: (1, Co).
    """
    N, C, H, W = x.shape
    Co = pww.shape[1]
    Cop = _round_up(Co, 128)                 # lane-dense output (unmasked vst)

    if ht is None:
        # Largest divisor of H whose (double-buffered) in+out blocks stay well
        # under a conservative scoped-VMEM budget (sized for v7x's 64 MiB).
        budget = 8 << 20
        ht = 1
        for d in range(1, H + 1):
            if H % d:
                continue
            if (d * W) % 8 and d != H:
                continue
            if 2 * d * W * (C + Cop) * 4 <= budget:
                ht = d
    assert H % ht == 0, "ht must divide H"

    # Channels-last, row-flattened activations: C on lanes, H*W on sublanes.
    # TODO(synk): keep activations NHWC end-to-end in a JAX graph instead of
    # paying this transpose (it is an extra HBM round trip of x).
    x2 = jnp.transpose(x, (0, 2, 3, 1)).reshape(N, H * W, C)

    # Zero-pad Co to Cop and pre-cast the pointwise weights to bf16 (halves the
    # weight DMA and feeds the MXU at native rate).
    pww_p = jnp.zeros((C, Cop), jnp.bfloat16).at[:, :Co].set(pww.astype(jnp.bfloat16))
    pwb_p = jnp.zeros((1, Cop), jnp.float32).at[:, :Co].set(pwb)

    grid = (N, H // ht)

    out = pl.pallas_call(
        functools.partial(dsconv_kernel, W=W),
        out_shape=jax.ShapeDtypeStruct((N, H * W, Cop), jnp.float32),
        grid_spec=pltpu.PrefetchScalarGridSpec(
            num_scalar_prefetch=0,
            grid=grid,
            in_specs=[
                # Halo row above the tile (clamped to row 0; zeroed at h == 0).
                pl.BlockSpec((1, W, C),
                             lambda n, h: (n, jnp.maximum(h * ht - 1, 0), 0)),
                # The ht rows of this tile.
                pl.BlockSpec((1, ht * W, C), lambda n, h: (n, h, 0)),
                # Halo row below (clamped to the last row; zeroed at h == last).
                pl.BlockSpec((1, W, C),
                             lambda n, h: (n, jnp.minimum(h * ht + ht, H - 1), 0)),
                pl.BlockSpec((9, 1, C), lambda n, h: (0, 0, 0)),
                pl.BlockSpec((1, C), lambda n, h: (0, 0)),
                pl.BlockSpec((C, Cop), lambda n, h: (0, 0)),
                pl.BlockSpec((1, Cop), lambda n, h: (0, 0)),
            ],
            out_specs=pl.BlockSpec((1, ht * W, Cop), lambda n, h: (n, h, 0)),
        ),
        compiler_params=pltpu.CompilerParams(
            dimension_semantics=("parallel", "parallel")),
    )(x2, x2, x2, dww, dwb, pww_p, pwb_p)

    # (N, H*W, Cop) -> (N, Co, H, W); pad channels sliced off outside the kernel.
    return jnp.transpose(out[:, :, :Co].reshape(N, H, W, Co), (0, 3, 1, 2))


def make_params(key, c_in, c_out):
    """Deterministic synthetic parameters matching DSConv.__init__ shapes."""
    ks = jax.random.split(key, 8)
    eps = 1e-5
    # depthwise conv: weight (C_in, 1, 3, 3), no bias
    dw_w = jax.random.normal(ks[0], (c_in, 1, 3, 3), jnp.float32) * 0.2
    # bn2d over C_in
    g1 = 1.0 + 0.1 * jax.random.normal(ks[1], (c_in,), jnp.float32)
    b1 = 0.1 * jax.random.normal(ks[2], (c_in,), jnp.float32)
    m1 = 0.1 * jax.random.normal(ks[3], (c_in,), jnp.float32)
    v1 = jnp.abs(jax.random.normal(ks[4], (c_in,), jnp.float32)) + 0.5
    # pointwise conv: weight (C_out, C_in, 1, 1), no bias
    pw_w = jax.random.normal(ks[5], (c_out, c_in, 1, 1), jnp.float32) * 0.2
    # bn2d over C_out
    g2 = 1.0 + 0.1 * jax.random.normal(ks[6], (c_out,), jnp.float32)
    b2 = 0.1 * jax.random.normal(ks[7], (c_out,), jnp.float32)
    m2 = jnp.zeros((c_out,), jnp.float32)
    v2 = jnp.ones((c_out,), jnp.float32)

    # Fold BN (inference mode) into conv weights / biases.
    s1 = g1 / jnp.sqrt(v1 + eps)                           # (C_in,)
    dww_ck = dw_w[:, 0] * s1[:, None, None]                # (C_in, 3, 3)
    # tap-major, channels-last: (9, 1, C_in) with tap index k = 3*i + j
    dww = jnp.transpose(dww_ck, (1, 2, 0)).reshape(9, 1, c_in)
    dwb = (b1 - m1 * s1).reshape(1, c_in)                  # (1, C_in)

    s2 = g2 / jnp.sqrt(v2 + eps)                           # (C_out,)
    pww = jnp.transpose(pw_w[:, :, 0, 0] * s2[:, None])    # (C_in, C_out)
    pwb = (b2 - m2 * s2).reshape(1, c_out)                 # (1, C_out)

    raw = dict(dw_w=dw_w, g1=g1, b1=b1, m1=m1, v1=v1,
               pw_w=pw_w, g2=g2, b2=b2, m2=m2, v2=v2, eps=eps)
    return (dww, dwb, pww, pwb), raw


def dsconv_reference(x, raw):
    """Plain-JAX f32 reference of DSConv forward (eval-mode BN) for verification."""
    eps = raw["eps"]
    C = x.shape[1]
    # depthwise 3x3, stride 1, same padding, groups=C
    y = jax.lax.conv_general_dilated(
        x, raw["dw_w"], window_strides=(1, 1), padding="SAME",
        feature_group_count=C,
        dimension_numbers=("NCHW", "OIHW", "NCHW"))
    y = (y - raw["m1"][None, :, None, None]) / jnp.sqrt(raw["v1"][None, :, None, None] + eps)
    y = y * raw["g1"][None, :, None, None] + raw["b1"][None, :, None, None]
    y = jnp.clip(y, 0.0, 6.0)                              # relu6
    # pointwise 1x1
    z = jnp.einsum("nchw,oc->nohw", y, raw["pw_w"][:, :, 0, 0])
    z = (z - raw["m2"][None, :, None, None]) / jnp.sqrt(raw["v2"][None, :, None, None] + eps)
    z = z * raw["g2"][None, :, None, None] + raw["b2"][None, :, None, None]
    return z


if __name__ == "__main__":
    key = jax.random.PRNGKey(0)
    kx, kp = jax.random.split(key)

    N, C_in, C_out, H, W = 2, 4, 8, 16, 16
    x = jax.random.normal(kx, (N, C_in, H, W), jnp.float32)

    (dww, dwb, pww, pwb), raw = make_params(kp, C_in, C_out)

    # ht=8 -> grid (N, 2): exercises both the interior-halo and border-halo paths.
    out = jax.block_until_ready(dsconv_pallas(x, dww, dwb, pww, pwb, ht=8))
    ref = jax.block_until_ready(dsconv_reference(x, raw))

    assert out.shape == (N, C_out, H, W)
    # The kernel uses bf16 MXU operands for the pointwise matmul (per perf
    # review), so the check vs. the f32 reference is tolerance-relaxed: bf16
    # quantization noise here is ~1e-2 worst-case, while a genuine tap/mask/
    # layout bug produces O(0.3+) errors at many positions.
    err = jnp.abs(out - ref)
    assert float(err.max()) < 1e-1 and float(err.mean()) < 1e-2, "mismatch vs reference"

    print("KERNEL_OK")
</pallas_src>

<mosaic_0001>
module attributes {stable_mosaic.version = 11 : i64} {
  func.func @dsconv_kernel(%arg0: i32, %arg1: i32, %arg2: memref<1x16x4xf32, #tpu.memory_space<vmem>>, %arg3: memref<1x128x4xf32, #tpu.memory_space<vmem>>, %arg4: memref<1x16x4xf32, #tpu.memory_space<vmem>>, %arg5: memref<9x1x4xf32, #tpu.memory_space<vmem>>, %arg6: memref<1x4xf32, #tpu.memory_space<vmem>>, %arg7: memref<4x128xbf16, #tpu.memory_space<vmem>>, %arg8: memref<1x128xf32, #tpu.memory_space<vmem>>, %arg9: memref<1x128x128xf32, #tpu.memory_space<vmem>>) attributes {dimension_semantics = [#tpu.dimension_semantics<parallel>, #tpu.dimension_semantics<parallel>], iteration_bounds = array<i64: 2, 2>, scalar_prefetch = 0 : i64, scratch_operands = 0 : i64, tpu.core_type = #tpu.core_type<tc>, window_params = [{transform_indices = @transform_0, window_bounds = array<i64: 1, 16, 4>}, {transform_indices = @transform_1, window_bounds = array<i64: 1, 128, 4>}, {transform_indices = @transform_2, window_bounds = array<i64: 1, 16, 4>}, {pipeline_mode = #tpu.pipeline_mode<synchronous>, transform_indices = @transform_3, window_bounds = array<i64: 9, 1, 4>}, {pipeline_mode = #tpu.pipeline_mode<synchronous>, transform_indices = @transform_4, window_bounds = array<i64: 1, 4>}, {pipeline_mode = #tpu.pipeline_mode<synchronous>, transform_indices = @transform_5, window_bounds = array<i64: 4, 128>}, {pipeline_mode = #tpu.pipeline_mode<synchronous>, transform_indices = @transform_6, window_bounds = array<i64: 1, 128>}, {transform_indices = @transform_7, window_bounds = array<i64: 1, 128, 128>}]} {
    %c0 = arith.constant 0 : index
    %c0_0 = arith.constant 0 : index
    %c0_1 = arith.constant 0 : index
    %0 = vector.load %arg2[%c0, %c0_0, %c0_1] : memref<1x16x4xf32, #tpu.memory_space<vmem>>, vector<1x16x4xf32>
    %1 = vector.shape_cast %0 : vector<1x16x4xf32> to vector<16x4xf32>
    %c0_i32 = arith.constant 0 : i32
    %2 = arith.cmpi eq, %arg1, %c0_i32 : i32
    %cst = arith.constant 0.000000e+00 : f32
    %cst_2 = arith.constant 1.000000e+00 : f32
    %3 = arith.select %2, %cst, %cst_2 : f32
    %4 = vector.broadcast %3 : f32 to vector<16x4xf32>
    %5 = arith.mulf %1, %4 : vector<16x4xf32>
    %c0_3 = arith.constant 0 : index
    %c0_4 = arith.constant 0 : index
    %c0_5 = arith.constant 0 : index
    %6 = vector.load %arg4[%c0_3, %c0_4, %c0_5] : memref<1x16x4xf32, #tpu.memory_space<vmem>>, vector<1x16x4xf32>
    %7 = vector.shape_cast %6 : vector<1x16x4xf32> to vector<16x4xf32>
    %c1_i32 = arith.constant 1 : i32
    %8 = arith.cmpi eq, %arg1, %c1_i32 : i32
    %cst_6 = arith.constant 0.000000e+00 : f32
    %cst_7 = arith.constant 1.000000e+00 : f32
    %9 = arith.select %8, %cst_6, %cst_7 : f32
    %10 = vector.broadcast %9 : f32 to vector<16x4xf32>
    %11 = arith.mulf %7, %10 : vector<16x4xf32>
    %c0_8 = arith.constant 0 : index
    %c0_9 = arith.constant 0 : index
    %c0_10 = arith.constant 0 : index
    %12 = vector.load %arg3[%c0_8, %c0_9, %c0_10] : memref<1x128x4xf32, #tpu.memory_space<vmem>>, vector<1x128x4xf32>
    %13 = vector.shape_cast %12 : vector<1x128x4xf32> to vector<128x4xf32>
    %14 = tpu.concatenate %5, %13, %11 in 0 : vector<16x4xf32>, vector<128x4xf32>, vector<16x4xf32> -> vector<160x4xf32>
    %15 = tpu.iota {dimensions = array<i32: 0>} : vector<160x1xi32>
    %c16_i32 = arith.constant 16 : i32
    %c0_i32_11 = arith.constant 0 : i32
    %16 = arith.cmpi eq, %c16_i32, %c0_i32_11 : i32
    %c1_i32_12 = arith.constant 1 : i32
    %17 = arith.select %16, %c1_i32_12, %c16_i32 : i32
    %18 = vector.broadcast %17 : i32 to vector<160x1xi32>
    %19 = arith.remsi %15, %18 : vector<160x1xi32>
    %c0_i32_13 = arith.constant 0 : i32
    %20 = vector.broadcast %c0_i32_13 : i32 to vector<160x1xi32>
    %21 = arith.cmpi ne, %19, %20 : vector<160x1xi32>
    %c0_i32_14 = arith.constant 0 : i32
    %22 = vector.broadcast %c0_i32_14 : i32 to vector<160x1xi32>
    %23 = arith.cmpi slt, %19, %22 : vector<160x1xi32>
    %c0_i32_15 = arith.constant 0 : i32
    %24 = arith.cmpi slt, %17, %c0_i32_15 : i32
    %25 = vector.broadcast %24 : i1 to vector<160x1xi1>
    %26 = vector.broadcast %25 : vector<160x1xi1> to vector<160x1xi1>
    %27 = arith.xori %23, %26 : vector<160x1xi1>
    %28 = arith.andi %27, %21 : vector<160x1xi1>
    %29 = vector.broadcast %17 : i32 to vector<160x1xi32>
    %30 = arith.addi %19, %29 : vector<160x1xi32>
    %31 = arith.select %28, %30, %19 : vector<160x1xi1>, vector<160x1xi32>
    %c0_i32_16 = arith.constant 0 : i32
    %32 = vector.broadcast %c0_i32_16 : i32 to vector<160x1xi32>
    %33 = arith.cmpi eq, %31, %32 : vector<160x1xi32>
    %c1_i32_17 = arith.constant 1 : i32
    %34 = tpu.dynamic_rotate %14 by %c1_i32_17 dim 0 : vector<160x4xf32>, i32 -> vector<160x4xf32>
    %cst_18 = arith.constant 0.000000e+00 : f32
    %35 = vector.shape_cast %33 : vector<160x1xi1> to vector<160x1xi1>
    %36 = vector.broadcast %35 : vector<160x1xi1> to vector<160x4xi1>
    %37 = vector.broadcast %cst_18 : f32 to vector<160x4xf32>
    %38 = arith.select %36, %37, %34 : vector<160x4xi1>, vector<160x4xf32>
    %c15_i32 = arith.constant 15 : i32
    %39 = vector.broadcast %c15_i32 : i32 to vector<160x1xi32>
    %40 = arith.cmpi eq, %31, %39 : vector<160x1xi32>
    %c159_i32 = arith.constant 159 : i32
    %41 = tpu.dynamic_rotate %14 by %c159_i32 dim 0 : vector<160x4xf32>, i32 -> vector<160x4xf32>
    %cst_19 = arith.constant 0.000000e+00 : f32
    %42 = vector.shape_cast %40 : vector<160x1xi1> to vector<160x1xi1>
    %43 = vector.broadcast %42 : vector<160x1xi1> to vector<160x4xi1>
    %44 = vector.broadcast %cst_19 : f32 to vector<160x4xf32>
    %45 = arith.select %43, %44, %41 : vector<160x4xi1>, vector<160x4xf32>
    %c0_20 = arith.constant 0 : index
    %c0_21 = arith.constant 0 : index
    %c0_22 = arith.constant 0 : index
    %46 = vector.load %arg5[%c0_20, %c0_21, %c0_22] : memref<9x1x4xf32, #tpu.memory_space<vmem>>, vector<9x1x4xf32>
    %c0_23 = arith.constant 0 : index
    %c0_24 = arith.constant 0 : index
    %47 = vector.load %arg6[%c0_23, %c0_24] : memref<1x4xf32, #tpu.memory_space<vmem>>, vector<1x4xf32>
    %48 = vector.extract_strided_slice %14 {offsets = [16, 0], sizes = [128, 4], strides = [1, 1]} : vector<160x4xf32> to vector<128x4xf32>
    %49 = vector.extract_strided_slice %46 {offsets = [4, 0, 0], sizes = [1, 1, 4], strides = [1, 1, 1]} : vector<9x1x4xf32> to vector<1x1x4xf32>
    %50 = vector.shape_cast %49 : vector<1x1x4xf32> to vector<1x4xf32>
    %51 = vector.broadcast %50 : vector<1x4xf32> to vector<128x4xf32>
    %52 = arith.mulf %48, %51 : vector<128x4xf32>
    %53 = vector.broadcast %47 : vector<1x4xf32> to vector<128x4xf32>
    %54 = arith.addf %53, %52 : vector<128x4xf32>
    %55 = vector.extract_strided_slice %38 {offsets = [0, 0], sizes = [128, 4], strides = [1, 1]} : vector<160x4xf32> to vector<128x4xf32>
    %56 = vector.extract_strided_slice %46 {offsets = [0, 0, 0], sizes = [1, 1, 4], strides = [1, 1, 1]} : vector<9x1x4xf32> to vector<1x1x4xf32>
    %57 = vector.shape_cast %56 : vector<1x1x4xf32> to vector<1x4xf32>
    %58 = vector.broadcast %57 : vector<1x4xf32> to vector<128x4xf32>
    %59 = arith.mulf %55, %58 : vector<128x4xf32>
    %60 = arith.addf %54, %59 : vector<128x4xf32>
    %61 = vector.extract_strided_slice %14 {offsets = [0, 0], sizes = [128, 4], strides = [1, 1]} : vector<160x4xf32> to vector<128x4xf32>
    %62 = vector.extract_strided_slice %46 {offsets = [1, 0, 0], sizes = [1, 1, 4], strides = [1, 1, 1]} : vector<9x1x4xf32> to vector<1x1x4xf32>
    %63 = vector.shape_cast %62 : vector<1x1x4xf32> to vector<1x4xf32>
    %64 = vector.broadcast %63 : vector<1x4xf32> to vector<128x4xf32>
    %65 = arith.mulf %61, %64 : vector<128x4xf32>
    %66 = arith.addf %60, %65 : vector<128x4xf32>
    %67 = vector.extract_strided_slice %45 {offsets = [0, 0], sizes = [128, 4], strides = [1, 1]} : vector<160x4xf32> to vector<128x4xf32>
    %68 = vector.extract_strided_slice %46 {offsets = [2, 0, 0], sizes = [1, 1, 4], strides = [1, 1, 1]} : vector<9x1x4xf32> to vector<1x1x4xf32>
    %69 = vector.shape_cast %68 : vector<1x1x4xf32> to vector<1x4xf32>
    %70 = vector.broadcast %69 : vector<1x4xf32> to vector<128x4xf32>
    %71 = arith.mulf %67, %70 : vector<128x4xf32>
    %72 = arith.addf %66, %71 : vector<128x4xf32>
    %73 = vector.extract_strided_slice %38 {offsets = [16, 0], sizes = [128, 4], strides = [1, 1]} : vector<160x4xf32> to vector<128x4xf32>
    %74 = vector.extract_strided_slice %46 {offsets = [3, 0, 0], sizes = [1, 1, 4], strides = [1, 1, 1]} : vector<9x1x4xf32> to vector<1x1x4xf32>
    %75 = vector.shape_cast %74 : vector<1x1x4xf32> to vector<1x4xf32>
    %76 = vector.broadcast %75 : vector<1x4xf32> to vector<128x4xf32>
    %77 = arith.mulf %73, %76 : vector<128x4xf32>
    %78 = arith.addf %72, %77 : vector<128x4xf32>
    %79 = vector.extract_strided_slice %45 {offsets = [16, 0], sizes = [128, 4], strides = [1, 1]} : vector<160x4xf32> to vector<128x4xf32>
    %80 = vector.extract_strided_slice %46 {offsets = [5, 0, 0], sizes = [1, 1, 4], strides = [1, 1, 1]} : vector<9x1x4xf32> to vector<1x1x4xf32>
    %81 = vector.shape_cast %80 : vector<1x1x4xf32> to vector<1x4xf32>
    %82 = vector.broadcast %81 : vector<1x4xf32> to vector<128x4xf32>
    %83 = arith.mulf %79, %82 : vector<128x4xf32>
    %84 = arith.addf %78, %83 : vector<128x4xf32>
    %85 = vector.extract_strided_slice %38 {offsets = [32, 0], sizes = [128, 4], strides = [1, 1]} : vector<160x4xf32> to vector<128x4xf32>
    %86 = vector.extract_strided_slice %46 {offsets = [6, 0, 0], sizes = [1, 1, 4], strides = [1, 1, 1]} : vector<9x1x4xf32> to vector<1x1x4xf32>
    %87 = vector.shape_cast %86 : vector<1x1x4xf32> to vector<1x4xf32>
    %88 = vector.broadcast %87 : vector<1x4xf32> to vector<128x4xf32>
    %89 = arith.mulf %85, %88 : vector<128x4xf32>
    %90 = arith.addf %84, %89 : vector<128x4xf32>
    %91 = vector.extract_strided_slice %14 {offsets = [32, 0], sizes = [128, 4], strides = [1, 1]} : vector<160x4xf32> to vector<128x4xf32>
    %92 = vector.extract_strided_slice %46 {offsets = [7, 0, 0], sizes = [1, 1, 4], strides = [1, 1, 1]} : vector<9x1x4xf32> to vector<1x1x4xf32>
    %93 = vector.shape_cast %92 : vector<1x1x4xf32> to vector<1x4xf32>
    %94 = vector.broadcast %93 : vector<1x4xf32> to vector<128x4xf32>
    %95 = arith.mulf %91, %94 : vector<128x4xf32>
    %96 = arith.addf %90, %95 : vector<128x4xf32>
    %97 = vector.extract_strided_slice %45 {offsets = [32, 0], sizes = [128, 4], strides = [1, 1]} : vector<160x4xf32> to vector<128x4xf32>
    %98 = vector.extract_strided_slice %46 {offsets = [8, 0, 0], sizes = [1, 1, 4], strides = [1, 1, 1]} : vector<9x1x4xf32> to vector<1x1x4xf32>
    %99 = vector.shape_cast %98 : vector<1x1x4xf32> to vector<1x4xf32>
    %100 = vector.broadcast %99 : vector<1x4xf32> to vector<128x4xf32>
    %101 = arith.mulf %97, %100 : vector<128x4xf32>
    %102 = arith.addf %96, %101 : vector<128x4xf32>
    %cst_25 = arith.constant 0.000000e+00 : f32
    %cst_26 = arith.constant 6.000000e+00 : f32
    %103 = vector.broadcast %cst_25 : f32 to vector<128x4xf32>
    %104 = arith.maximumf %103, %102 : vector<128x4xf32>
    %105 = vector.broadcast %cst_26 : f32 to vector<128x4xf32>
    %106 = arith.minimumf %105, %104 : vector<128x4xf32>
    %107 = arith.truncf %106 : vector<128x4xf32> to vector<128x4xbf16>
    %c0_27 = arith.constant 0 : index
    %c0_28 = arith.constant 0 : index
    %108 = vector.load %arg7[%c0_27, %c0_28] : memref<4x128xbf16, #tpu.memory_space<vmem>>, vector<4x128xbf16>
    %cst_29 = arith.constant dense<0.000000e+00> : vector<128x128xf32>
    %109 = tpu.matmul %107, %108, %cst_29 {dimension_numbers = #tpu.dot_dimension_numbers<[1], [0], [0], [1], [0, 0, 1, 1], [], []>} : vector<128x4xbf16>, vector<4x128xbf16>, vector<128x128xf32> -> vector<128x128xf32>
    %c0_30 = arith.constant 0 : index
    %c0_31 = arith.constant 0 : index
    %110 = vector.load %arg8[%c0_30, %c0_31] : memref<1x128xf32, #tpu.memory_space<vmem>>, vector<1x128xf32>
    %111 = vector.broadcast %110 : vector<1x128xf32> to vector<128x128xf32>
    %112 = arith.addf %109, %111 : vector<128x128xf32>
    %c0_32 = arith.constant 0 : index
    %c0_33 = arith.constant 0 : index
    %c0_34 = arith.constant 0 : index
    %113 = vector.load %arg9[%c0_32, %c0_33, %c0_34] : memref<1x128x128xf32, #tpu.memory_space<vmem>>, vector<1x128x128xf32>
    %114 = vector.shape_cast %113 : vector<1x128x128xf32> to vector<128x128xf32>
    %115 = vector.shape_cast %112 : vector<128x128xf32> to vector<1x128x128xf32>
    tpu.vector_store %arg9[%c0_32, %c0_33, %c0_34], %115 {strides = array<i32>} : memref<1x128x128xf32, #tpu.memory_space<vmem>>, vector<1x128x128xf32>,
    return
  }
  func.func @transform_0(%arg0: i32, %arg1: i32) -> (i32, i32, i32) {
    %c8_i32 = arith.constant 8 : i32
    %0 = arith.muli %arg1, %c8_i32 : i32
    %c1_i32 = arith.constant 1 : i32
    %1 = arith.subi %0, %c1_i32 : i32
    %c0_i32 = arith.constant 0 : i32
    %2 = arith.maxsi %1, %c0_i32 : i32
    %c0_i32_0 = arith.constant 0 : i32
    %c0_i32_1 = arith.constant 0 : i32
    return %arg0, %2, %c0_i32_0 : i32, i32, i32
  }
  func.func @transform_1(%arg0: i32, %arg1: i32) -> (i32, i32, i32) {
    %c0_i32 = arith.constant 0 : i32
    %c0_i32_0 = arith.constant 0 : i32
    return %arg0, %arg1, %c0_i32 : i32, i32, i32
  }
  func.func @transform_2(%arg0: i32, %arg1: i32) -> (i32, i32, i32) {
    %c8_i32 = arith.constant 8 : i32
    %0 = arith.muli %arg1, %c8_i32 : i32
    %c8_i32_0 = arith.constant 8 : i32
    %1 = arith.addi %0, %c8_i32_0 : i32
    %c15_i32 = arith.constant 15 : i32
    %2 = arith.minsi %1, %c15_i32 : i32
    %c0_i32 = arith.constant 0 : i32
    %c0_i32_1 = arith.constant 0 : i32
    return %arg0, %2, %c0_i32 : i32, i32, i32
  }
  func.func @transform_3(%arg0: i32, %arg1: i32) -> (i32, i32, i32) {
    %c0_i32 = arith.constant 0 : i32
    %c0_i32_0 = arith.constant 0 : i32
    %c0_i32_1 = arith.constant 0 : i32
    %c0_i32_2 = arith.constant 0 : i32
    return %c0_i32, %c0_i32_0, %c0_i32_1 : i32, i32, i32
  }
  func.func @transform_4(%arg0: i32, %arg1: i32) -> (i32, i32) {
    %c0_i32 = arith.constant 0 : i32
    %c0_i32_0 = arith.constant 0 : i32
    %c0_i32_1 = arith.constant 0 : i32
    return %c0_i32, %c0_i32_0 : i32, i32
  }
  func.func @transform_5(%arg0: i32, %arg1: i32) -> (i32, i32) {
    %c0_i32 = arith.constant 0 : i32
    %c0_i32_0 = arith.constant 0 : i32
    %c0_i32_1 = arith.constant 0 : i32
    return %c0_i32, %c0_i32_0 : i32, i32
  }
  func.func @transform_6(%arg0: i32, %arg1: i32) -> (i32, i32) {
    %c0_i32 = arith.constant 0 : i32
    %c0_i32_0 = arith.constant 0 : i32
    %c0_i32_1 = arith.constant 0 : i32
    return %c0_i32, %c0_i32_0 : i32, i32
  }
  func.func @transform_7(%arg0: i32, %arg1: i32) -> (i32, i32, i32) {
    %c0_i32 = arith.constant 0 : i32
    %c0_i32_0 = arith.constant 0 : i32
    return %arg0, %arg1, %c0_i32 : i32, i32, i32
  }
}

</mosaic_0001>

<bundles_post_ra>
// kernel: tpu_custom_call.1
= control target key start
LH: loop header
LB: loop body
LE: loop exit
PB: predicated region body
PF: predicated region fallthrough
CT: control target
= control target key end

     0   :  { %s2940_s0 = inlined_call_operand.vmem [shape: f32[2,256,4], index: 0, kind: input, shape index: {}]   ;;  %s2941_s1 = inlined_call_operand.vmem [shape: f32[2,256,4], index: 1, kind: input, shape index: {}]   ;;  %s2942_s2 = inlined_call_operand.vmem [shape: f32[2,256,4], index: 2, kind: input, shape index: {}]   ;;  %s2943_s3 = inlined_call_operand.vmem [shape: f32[9,1,4], index: 3, kind: input, shape index: {}]   ;;  %s2944_s4 = inlined_call_operand.vmem [shape: f32[1,4], index: 4, kind: input, shape index: {}]   ;;  %s2945_s5 = inlined_call_operand.vmem [shape: bf16[4,128], index: 5, kind: input, shape index: {}]   ;;  %s2946_s6 = inlined_call_operand.vmem [shape: f32[1,128], index: 6, kind: input, shape index: {}]   ;;  %s2947_s7 = inlined_call_operand.hbm [shape: f32[2,256,128], index: 7, kind: output, shape index: {}]  }
   0x1   :  { %2970 = sst [smem:[#allocation17_spill]] %s2941_s1 }
   0x2   :  { %2971 = sst [smem:[#allocation18_spill]] %s2944_s4 }
   0x3   :  { %12 = vsyncpa [#allocation3], 0 }
   0x4   :  { %14 = vsyncpa [#allocation3 + $0x1], 0  ;;  %s1945_s24 = smov 0   ;;  %s1947_s25 = smov 0  }
   0x5   :  { %s1949_s26 = smov 0   ;;  %s1951_s27 = smov 0  }
   0x6   :  { %s1953_s28 = smov 0   ;;  %s1955_s29 = smov 0  }
   0x7   :  { %s1957_s30 = smov 0   ;;  %s1959_s8 = smov 0  }
   0x8 LB: > { %s1652_s9 = sadd.s32 4294967295, %s1900_s8   ;;  %s1653_s10 = sadd.s32 4294967294, %s1900_s8   ;;  %s1900_s8 = sphi %s1959_s8, %s20_s8   ;;  %s1896_s30 = sphi %s1957_s30, %s3047_s30   ;;  %s1892_s29 = sphi %s1955_s29, %s3046_s29   ;;  %s1888_s28 = sphi %s1953_s28, %s3045_s28   ;;  %s1884_s27 = sphi %s1951_s27, %s3044_s27   ;;  %s1880_s26 = sphi %s1949_s26, %s3043_s26   ;;  %s1876_s25 = sphi %s1947_s25, %s3042_s25   ;;  %s1872_s24 = sphi %s1945_s24, %s3041_s24  }
   0x9   : > { %s29_s11 = sadd.s32 1, %s1892_s29  ;;  %s32_s12 = sadd.s32 1, %s1896_s30 }
   0xa   : > { %p30_p0 = scmp.ge.s32.totalorder %s29_s11, 2  ;;  %p235_p1 = scmp.ne.s32.totalorder %s1880_s26, %s1876_s25 }
   0xb   : > { %p236_p2 = scmp.eq.s32.totalorder %s1652_s9, 3  ;;  %p241_p5 = scmp.ne.s32.totalorder %s1876_s25, %s1872_s24 }
   0xc   : > { %s3049_s11 = smov (%p30_p0, %s29_s11), 0  ;;  %s3051_s12 = smov (!%p30_p0, %s32_s12), %s1896_s30 }
   0xd   : > { %s221_s13 = ssub.s32 %s1892_s29, %s3049_s11  ;;  %p1996_p3 = por %p236_p2, %p235_p1 }
   0xe   : > { %p34_p4 = scmp.ge.s32.totalorder %s3051_s12, 2  ;;  %p242_p6 = scmp.eq.s32.totalorder %s1653_s10, 3 }
   0xf   : > { %p1662_p7 = scmp.ge.s32.totalorder %s1900_s8, 1  ;;  %p327_p9 = scmp.lt.s32.totalorder %s1900_s8, 5 }
  0x10   : > { %s3053_s12 = smov (%p34_p4, %s3051_s12), 0  ;;  %p2005_p8 = por %p242_p6, %p241_p5 }
  0x11   : > { %s220_s16 = ssub.s32 %s1896_s30, %s3053_s12  ;;  %s225_s17 = sadd.s32 1, %s1880_s26 }
  0x12   : > { %s222_s18 = sor.u32 %s221_s13, %s220_s16  ;;  %p328_p10 = pnand %p1662_p7, %p327_p9 }
  0x13   : > { %p223_p11 = scmp.eq.s32.totalorder %s222_s18, 0 }
  0x14   : > { %331 = sbr.rel (%p328_p10) target bundleno = 396 (0x18c), region = 48 }
  0x15   : > { %s2014_s19 = scalar_select %p223_p11, %s1880_s26, %s225_s17  }
  0x1b   : > { %v1368_v0 = vld [vmem:[%s2945_s5] sm:$0x3]  ;;  %vm1401_vm0 = vcmask 1041408   ;;  %p394_p12 = scmp.lt.s32.totalorder %s1888_s28, 1  ;;  %s2021_s22 = sshll.u32 %s1884_s27, 4  ;;  %v467_v1 = vlaneseq  ;;  %vm1376_vm10 = vcmask 31744  }
  0x1c   : > { %1731 = vmatprep.subr.msk.bf16.mxu1 %vm1401_vm0, %v1368_v0  ;;  %v1403_v2 = vsel %vm1401_vm0, %v1368_v0, 0  ;;  %1730 = vmatprep.subr.msk.bf16.mxu0 %vm1401_vm0, %v1368_v0  ;;  %p410_p13 = scmp.lt.s32.totalorder %s2021_s22, 31  ;;  %v2042_v11 = vld [vmem:[%s2943_s3 + $0x1] ss:$0 sm:$0xff]  ;;  %s2974_s1 = sld [smem:[#allocation17_spill]] }
  0x1d   : > { %1729 = vmatpush3.bf16.msra.mxu1 %v1403_v2  ;;  %s395_s23 = scalar_select %p394_p12, %s1888_s28, 1  ;;  %v2025_v3 = vshrl.u32 %v467_v1, 7  ;;  %1711 = vmatpush3.bf16.msra.mxu0 %v1403_v2  ;;  %v2053_v19 = vld [vmem:[%s2943_s3 + $0x4] ss:$0 sm:$0xff] }
  0x1e   : > { %s411_s9 = scalar_select %p410_p13, %s2021_s22, 31 }
  0x1f   : > { %s2028_s10 = sshll.u32 %s395_s23, 5  ;;  %v476_v4 = vadd.s32 64, %v2025_v3  ;;  %v477_v5 = vadd.s32 72, %v2025_v3  ;;  %v478_v6 = vadd.s32 80, %v2025_v3  ;;  %v479_v7 = vadd.s32 88, %v2025_v3  ;;  %s1664_s16 = sshll.u32 %s1884_s27, 3 }
  0x20   : > { %s413_s13 = sadd.s32 %s2028_s10, %s411_s9  ;;  %v480_v8 = vadd.s32 96, %v2025_v3  ;;  %v481_v9 = vadd.s32 104, %v2025_v3  ;;  %v482_v10 = vadd.s32 112, %v2025_v3  ;;  %vm768_vm1 = vcmp.lt.s32.totalorder %v2025_v3, 1  ;;  %s2158_s17 = sadd.s32 4294967295, %s1664_s16 }
  0x21   : > { %s1671_s18 = sshll.u32 %s413_s13, 3  ;;  %v548_v12 = vand.u32 15, %v476_v4  ;;  %v555_v13 = vand.u32 15, %v477_v5  ;;  %v562_v14 = vand.u32 15, %v478_v6  ;;  %v569_v15 = vand.u32 15, %v479_v7  ;;  %p391_p0 = scmp.gt.s32.totalorder %s2158_s17, 0 }
  0x22   : > { %s2047_s23 = scalar_lea.vmem %s2974_s1, %s1671_s18  ;;  %v576_v16 = vand.u32 15, %v480_v8  ;;  %v583_v17 = vand.u32 15, %v481_v9  ;;  %v590_v18 = vand.u32 15, %v482_v10  ;;  %vm889_vm2 = vcmp.lt.s32.totalorder %v2025_v3, 7  ;;  %s2173_s18 = sadd.s32 8, %s1664_s16 }
  0x23   : > { %v2056_v20 = vld [vmem:[%s2047_s23 + $0x28] sm:$0xff]  ;;  %v2059_v21 = vld [vmem:[%s2047_s23 + $0x30] sm:$0xff]  ;;  %v2062_v22 = vld [vmem:[%s2047_s23 + $0x38] sm:$0xff]  ;;  %vm2064_vm3 = vcmp.eq.s32.totalorder %v548_v12, 0  ;;  %vm2068_vm4 = vcmp.eq.s32.totalorder %v562_v14, 0  ;;  %vm2072_vm5 = vcmp.eq.s32.totalorder %v555_v13, 15 }
  0x24   : > { %v2077_v26 = vld [vmem:[%s2047_s23 + $0x40] sm:$0xff]  ;;  %v2080_v27 = vld [vmem:[%s2047_s23 + $0x48] sm:$0xff]  ;;  %v2083_v28 = vld [vmem:[%s2047_s23 + $0x50] sm:$0xff]  ;;  %vm2085_vm6 = vcmp.eq.s32.totalorder %v576_v16, 0  ;;  %vm2089_vm7 = vcmp.eq.s32.totalorder %v590_v18, 0  ;;  %v755_v31 = vrot.slane %v2056_v20, 7  ;;  %v2096_v32 = vmul.f32 %v2042_v11, %v2059_v21 }
  0x25   : > { %2981 = vst [vmem:[#allocation5_spill] sm:$0xff] %v2077_v26  ;;  %v2099_v33 = vld [vmem:[%s2047_s23 + $0x58] sm:$0xff]  ;;  %v2102_v34 = vld [vmem:[%s2047_s23 + $0x60] sm:$0xff]  ;;  %v2105_v35 = vld [vmem:[%s2047_s23 + $0x68] sm:$0xff]  ;;  %v756_v36 = vrot.slane %v2059_v21, 7  ;;  %v757_v37 = vrot.slane %v2062_v22, 7  ;;  %v994_v39 = vmul.f32 %v2053_v19, %v2077_v26  ;;  %v995_v2 = vmul.f32 %v2053_v19, %v2080_v27 }
  0x26   : > { %v758_v38 = vrot.slane %v2077_v26, 7  ;;  %v759_v40 = vrot.slane %v2080_v27, 7  ;;  %v760_v41 = vrot.slane %v2083_v28, 7  ;;  %v761_v42 = vrot.slane %v2099_v33, 7  ;;  %v2203_v9 = vld [vmem:[%s2943_s3] ss:$0 sm:$0xff] }
  0x27   : > { %v762_v43 = vrot.slane %v2102_v34, 7  ;;  %v2951_v44 = vrot.slane %v2105_v35, 7  ;;  %v2121_v46 = vsel %vm768_vm1, %v756_v36, %v757_v37  ;;  %v780_v47 = vsel %vm768_vm1, %v755_v31, %v756_v36  ;;  %s2996_s4 = sld [smem:[#allocation18_spill]]  ;;  %p419_p1 = scmp.lt.s32.totalorder %s2173_s18, 15 }
  0x28   : > { %v778_v45 = vsel %vm768_vm1, %v757_v37, %v758_v38  ;;  %2986 = vst [vmem:[#allocation6_spill] sm:$0xff] %v2121_v46  ;;  %v2132_v49 = vsel %vm768_vm1, %v760_v41, %v761_v42  ;;  %v776_v50 = vsel %vm768_vm1, %v759_v40, %v760_v41  ;;  %v2138_v51 = vsel %vm768_vm1, %v758_v38, %v759_v40  ;;  %s3055_s17 = smov (!%p391_p0, %s2158_s17), 0  ;;  %p439_p5 = scmp.eq.s32.totalorder %s1884_s27, 0 }
  0x29   : > { %v774_v48 = vsel %vm768_vm1, %v761_v42, %v762_v43  ;;  %2987 = vst [vmem:[#allocation7_spill] sm:$0xff] %v2138_v51  ;;  %v2144_v52 = vsel %vm768_vm1, %v762_v43, %v2951_v44  ;;  %v2148_v53 = vsel %vm2064_vm3, 0.0, %v780_v47  ;;  %v2152_v54 = vsel %vm2068_vm4, 0.0, %v778_v45  ;;  %s3057_s18 = smov (!%p419_p1, %s2173_s18), 15  ;;  %v2268_v45 = vld [vmem:[%s2943_s3 + $0x2] ss:$0 sm:$0xff] }
  0x2a   : > { %2988 = vst [vmem:[#allocation8_spill] sm:$0xff] %v2148_v53  ;;  %2989 = vst [vmem:[#allocation9_spill] sm:$0xff] %v2152_v54  ;;  %v2156_v55 = vsel %vm2085_vm6, 0.0, %v776_v50  ;;  %v2162_v56 = vsel %vm2089_vm7, 0.0, %v774_v48  ;;  %vm2164_vm8 = vcmp.eq.s32.totalorder %v569_v15, 15  ;;  %vm2168_vm9 = vcmp.eq.s32.totalorder %v583_v17, 15 }
  0x2b   : > { %v2954_v59 = vrot.slane %v2059_v21, 1  ;;  %v878_v60 = vrot.slane %v2062_v22, 1  ;;  %v879_v61 = vrot.slane %v2077_v26, 1  ;;  %v880_v62 = vrot.slane %v2080_v27, 1  ;;  %s2948_s21 = sshll.u32 %s3055_s17, 1  ;;  %s2949_s9 = sshll.u32 %s3057_s18, 1 }
  0x2c   : > { %v881_v63 = vrot.slane %v2083_v28, 1  ;;  %v882_v0 = vrot.slane %v2099_v33, 1  ;;  %v883_v1 = vrot.slane %v2102_v34, 1  ;;  %v996_v4 = vmul.f32 %v2053_v19, %v2083_v28  ;;  %p2302_p2 = scmp.lt.s32.totalorder %s2948_s21, 31  ;;  %p2314_p4 = scmp.lt.s32.totalorder %s2949_s9, 31 }
  0x2d   : > { %v2190_v6 = vsel %vm889_vm2, %v879_v61, %v880_v62  ;;  %v899_v7 = vsel %vm889_vm2, %v878_v60, %v879_v61  ;;  %v2198_v8 = vsel %vm889_vm2, %v2954_v59, %v878_v60  ;;  %v2208_v10 = vld [vmem:[%s2996_s4] ss:$0 sm:$0xff]  ;;  %v997_v17 = vmul.f32 %v2053_v19, %v2099_v33  ;;  %s3002_s21 = sshll.u32 %s3055_s17, 1  ;;  %s3003_s17 = sshll.u32 %s3057_s18, 1 }
  0x2e   : > { %v897_v5 = vsel %vm889_vm2, %v880_v62, %v881_v63  ;;  %2994 = vst [vmem:[#allocation10_spill] sm:$0xff] %v2190_v6  ;;  %2995 = vst [vmem:[#allocation11_spill] sm:$0xff] %v2198_v8  ;;  %v895_v12 = vsel %vm889_vm2, %v882_v0, %v883_v1  ;;  %v2217_v13 = vsel %vm889_vm2, %v881_v63, %v882_v0  ;;  %v2221_v14 = vsel %vm2072_vm5, 0.0, %v899_v7  ;;  %s3059_s21 = smov (!%p2302_p2, %s3002_s21), 31  ;;  %s3061_s17 = smov (!%p2314_p4, %s3003_s17), 31 }
  0x2f   : > { %2997 = vst [vmem:[#allocation12_spill] sm:$0xff] %v2221_v14  ;;  %v2225_v15 = vsel %vm2164_vm8, 0.0, %v897_v5  ;;  %v2229_v16 = vsel %vm2168_vm9, 0.0, %v895_v12  ;;  %v998_v18 = vmul.f32 %v2053_v19, %v2102_v34  ;;  %v999_v23 = vmul.f32 %v2053_v19, %v2105_v35  ;;  %v2291_v5 = vld [vmem:[%s2943_s3 + $0x3] ss:$0 sm:$0xff]  ;;  %s399_s1 = sadd.s32 %s2028_s10, %s3059_s21  ;;  %s427_s4 = sadd.s32 %s2028_s10, %s3061_s17 }
  0x30   : > { %2998 = vst [vmem:[#allocation13_spill] sm:$0xff] %v2225_v15  ;;  %v1016_v24 = vadd.f32 %v2208_v10, %v994_v39  ;;  %v1017_v25 = vadd.f32 %v2208_v10, %v995_v2  ;;  %v1018_v29 = vadd.f32 %v2208_v10, %v996_v4  ;;  %v1038_v30 = vmul.f32 %v2203_v9, %v2148_v53  ;;  %s1668_s10 = sshll.u32 %s399_s1, 3  ;;  %s1675_s18 = sshll.u32 %s427_s4, 3 }
  0x31   : > { %v1019_v36 = vadd.f32 %v2208_v10, %v997_v17  ;;  %v1020_v37 = vadd.f32 %v2208_v10, %v998_v18  ;;  %v1021_v38 = vadd.f32 %v2208_v10, %v999_v23  ;;  %v1039_v39 = vmul.f32 %v2203_v9, %v2121_v46  ;;  %p446_p6 = scmp.eq.s32.totalorder %s1884_s27, 1  ;;  %s401_s17 = scalar_lea.vmem %s2940_s0, %s1668_s10 }
  0x32   : > { %v1040_v40 = vmul.f32 %v2203_v9, %v2152_v54  ;;  %v1041_v41 = vmul.f32 %v2203_v9, %v2138_v51  ;;  %v1042_v42 = vmul.f32 %v2203_v9, %v2156_v55  ;;  %v1043_v43 = vmul.f32 %v2203_v9, %v2132_v49  ;;  %s2419_s13 = scalar_select %p439_p5, 0.0, 1.0 }
  0x33   : > { %v2272_v47 = vmul.f32 %v2203_v9, %v2162_v56  ;;  %v2276_v48 = vmul.f32 %v2203_v9, %v2144_v52  ;;  %v1054_v50 = vadd.f32 %v1038_v30, %v1016_v24  ;;  %v1055_v57 = vadd.f32 %v1039_v39, %v1017_v25  ;;  %s2432_s1 = scalar_lea.vmem %s2942_s2, %s1675_s18  ;;  %s386_s27 = sand.u32 1, %s1876_s25  }
  0x34   : > { %v1056_v58 = vadd.f32 %v1040_v40, %v1018_v29  ;;  %v1057_v60 = vadd.f32 %v1041_v41, %v1019_v36  ;;  %v1058_v61 = vadd.f32 %v1042_v42, %v1020_v37  ;;  %v1059_v62 = vadd.f32 %v1043_v43, %v1021_v38  ;;  %v2321_v37 = vld [vmem:[%s2943_s3 + $0x5] ss:$0 sm:$0xff]  ;;  %s2442_s4 = scalar_select %p446_p6, 0.0, 1.0 }
  0x35   : > { %2999 = vst [vmem:[#allocation14_spill] sm:$0xff] %v2276_v48  ;;  %v1077_v63 = vmul.f32 %v2042_v11, %v2062_v22  ;;  %v1078_v0 = vmul.f32 %v2042_v11, %v2077_v26  ;;  %v1079_v2 = vmul.f32 %v2042_v11, %v2080_v27  ;;  %v1080_v4 = vmul.f32 %v2042_v11, %v2083_v28  ;;  %s1697_s21 = sshll.u32 %s1888_s28, 5 }
  0x36   : > { %v1081_v7 = vmul.f32 %v2042_v11, %v2099_v33  ;;  %v1092_v12 = vadd.f32 %v2096_v32, %v1054_v50  ;;  %v1114_v17 = vmul.f32 %v2268_v45, %v2198_v8  ;;  %v1115_v27 = vmul.f32 %v2268_v45, %v2221_v14  ;;  %s1531_s16 = sadd.s32 %s1697_s21, %s2021_s22 }
  0x37   : > { %v1093_v18 = vadd.f32 %v1077_v63, %v1055_v57  ;;  %v1094_v23 = vadd.f32 %v1078_v0, %v1056_v58  ;;  %v1095_v24 = vadd.f32 %v1079_v2, %v1057_v60  ;;  %v1096_v25 = vadd.f32 %v1080_v4, %v1058_v61  ;;  %v2344_v63 = vld [vmem:[%s2943_s3 + $0x6] ss:$0 sm:$0xff]  ;;  %v2349_v0 = vld [vmem:[%s2943_s3 + $0x7] ss:$0 sm:$0xff] }
  0x38   : > { %v1097_v29 = vadd.f32 %v1081_v7, %v1059_v62  ;;  %v1116_v30 = vmul.f32 %v2268_v45, %v2190_v6  ;;  %v1117_v32 = vmul.f32 %v2268_v45, %v2225_v15  ;;  %v1118_v36 = vmul.f32 %v2268_v45, %v2217_v13 }
  0x39   : > { %v1119_v38 = vmul.f32 %v2268_v45, %v2229_v16  ;;  %v1130_v39 = vadd.f32 %v1114_v17, %v1092_v12  ;;  %v1131_v40 = vadd.f32 %v1115_v27, %v1093_v18  ;;  %v1152_v41 = vmul.f32 %v2291_v5, %v2152_v54  ;;  %v2364_v17 = vld [vmem:[%s2943_s3 + $0x8] ss:$0 sm:$0xff] }
  0x3a   : > { %v1132_v42 = vadd.f32 %v1116_v30, %v1094_v23  ;;  %v1133_v43 = vadd.f32 %v1117_v32, %v1095_v24  ;;  %v1134_v50 = vadd.f32 %v1118_v36, %v1096_v25  ;;  %v1153_v57 = vmul.f32 %v2291_v5, %v2138_v51 }
  0x3b   : > { %v1135_v58 = vadd.f32 %v1119_v38, %v1097_v29  ;;  %v1154_v60 = vmul.f32 %v2291_v5, %v2156_v55  ;;  %v1155_v61 = vmul.f32 %v2291_v5, %v2132_v49  ;;  %v1156_v62 = vmul.f32 %v2291_v5, %v2162_v56 }
  0x3c   : > { %v1157_v2 = vmul.f32 %v2291_v5, %v2144_v52  ;;  %v1168_v4 = vadd.f32 %v1152_v41, %v1130_v39  ;;  %v1169_v7 = vadd.f32 %v1153_v57, %v1131_v40  ;;  %v1190_v12 = vmul.f32 %v2321_v37, %v2190_v6  ;;  %v2383_v41 = vld [vmem:[%s2047_s23 + $0x70] sm:$0xff] }
  0x3d   : > { %v1170_v27 = vadd.f32 %v1154_v60, %v1132_v42  ;;  %v1171_v18 = vadd.f32 %v1155_v61, %v1133_v43  ;;  %v2366_v23 = vadd.f32 %v1156_v62, %v1134_v50  ;;  %v1191_v24 = vmul.f32 %v2321_v37, %v2225_v15 }
  0x3e   : > { %v2370_v25 = vadd.f32 %v1157_v2, %v1135_v58  ;;  %v1192_v29 = vmul.f32 %v2321_v37, %v2217_v13  ;;  %v1193_v30 = vmul.f32 %v2321_v37, %v2229_v16  ;;  %v1206_v32 = vadd.f32 %v1190_v12, %v1168_v4 }
  0x3f   : > { %v1207_v36 = vadd.f32 %v1191_v24, %v1169_v7  ;;  %v1228_v38 = vmul.f32 %v2344_v63, %v2156_v55  ;;  %v1229_v39 = vmul.f32 %v2344_v63, %v2132_v49  ;;  %v1266_v40 = vmul.f32 %v2349_v0, %v2083_v28 }
  0x40   : > { %v1208_v42 = vadd.f32 %v1192_v29, %v1170_v27  ;;  %v1209_v43 = vadd.f32 %v1193_v30, %v1171_v18  ;;  %v1267_v50 = vmul.f32 %v2349_v0, %v2099_v33  ;;  %v1304_v57 = vmul.f32 %v2364_v17, %v2217_v13 }
  0x41   : > { %v1244_v55 = vadd.f32 %v1228_v38, %v1206_v32  ;;  %v1245_v58 = vadd.f32 %v1229_v39, %v1207_v36  ;;  %v1305_v49 = vmul.f32 %v2364_v17, %v2229_v16  ;;  %v483_v28 = vadd.s32 120, %v2025_v3 }
  0x42   : > { %v884_v60 = vrot.slane %v2105_v35, 1  ;;  %v2950_v61 = vrot.slane %v2383_v41, 1  ;;  %v1000_v33 = vmul.f32 %v2053_v19, %v2383_v41  ;;  %v1082_v13 = vmul.f32 %v2042_v11, %v2102_v34 }
  0x43   : > { %v1282_v62 = vadd.f32 %v1266_v40, %v1244_v55  ;;  %v1283_v2 = vadd.f32 %v1267_v50, %v1245_v58  ;;  %v597_v4 = vand.u32 15, %v483_v28  ;;  %v1230_v16 = vmul.f32 %v2344_v63, %v2162_v56  ;;  %v437_v55 = vld [vmem:[%s401_s17] sm:$0xff]  ;;  %v438_v58 = vld [vmem:[%s401_s17 + $0x8] sm:$0xff]  ;;  %s1698_s17 = sshll.u32 %s1531_s16, 7 }
  0x44   : > { %v893_v7 = vsel %vm889_vm2, %v884_v60, %v2950_v61  ;;  %v894_v12 = vsel %vm889_vm2, %v883_v1, %v884_v60  ;;  %v1022_v27 = vadd.f32 %v2208_v10, %v1000_v33  ;;  %v1231_v18 = vmul.f32 %v2344_v63, %v2144_v52  ;;  %s2878_s20 = scalar_lea.hbm %s2947_s7, %s1698_s17 }
  0x45   : > { %v1320_v56 = vadd.f32 %v1304_v57, %v1282_v62  ;;  %v1321_v24 = vadd.f32 %v1305_v49, %v1283_v2  ;;  %vm864_vm11 = vcmp.eq.s32.totalorder %v597_v4, 15  ;;  %v1120_v29 = vmul.f32 %v2268_v45, %v894_v12  ;;  %v445_v62 = vld [vmem:[%s2432_s1 + $0x8] sm:$0xff] }
  0x46   : > { %v965_v30 = vsel %vm864_vm11, 0.0, %v893_v7  ;;  %v1060_v1 = vadd.f32 %v2272_v47, %v1022_v27  ;;  %v2427_v32 = vmul.f32 %v2321_v37, %v894_v12  ;;  %v1246_v52 = vadd.f32 %v1230_v16, %v1208_v42 }
  0x47   : > { %v1336_v36 = vmax.f32 %v1320_v56, 0.0  ;;  %v1337_v38 = vmax.f32 %v1321_v24, 0.0  ;;  %v2435_v39 = vmul.f32 %v2268_v45, %v965_v30  ;;  %v2438_v40 = vmul.f32 %v2321_v37, %v965_v30 }
  0x48   : > { %v1098_v47 = vadd.f32 %v1082_v13, %v1060_v1  ;;  %v1247_v42 = vadd.f32 %v1231_v18, %v1209_v43  ;;  %v1268_v50 = vmul.f32 %v2349_v0, %v2102_v34  ;;  %v1269_v57 = vmul.f32 %v2349_v0, %v2105_v35 }
  0x49   : > { %3004 = vst [vmem:[#allocation15_spill] sm:$0xff] %v2435_v39  ;;  %v1352_v49 = vmin.f32 %v1336_v36, 6.0  ;;  %v1353_v28 = vmin.f32 %v1337_v38, 6.0  ;;  %v1306_v60 = vmul.f32 %v2364_v17, %v894_v12  ;;  %v1307_v33 = vmul.f32 %v2364_v17, %v965_v30 }
  0x4a   : > { %v2451_v2 = vadd.f32 %v1120_v29, %v1098_v47  ;;  %v1284_v43 = vadd.f32 %v1268_v50, %v1246_v52  ;;  %v1285_v13 = vadd.f32 %v1269_v57, %v1247_v42  ;;  %v441_v4 = vstv %s2419_s13  ;;  %v2472_v50 = vld [vmem:[%s2047_s23] sm:$0xff] }
  0x4b   : > { %v1364_v34 = vpack.c.bf16 %v1353_v28, %v1352_v49  ;;  %v2454_v16 = vmul.f32 %v441_v4, %v437_v55  ;;  %v2456_v7 = vmul.f32 %v441_v4, %v438_v58  ;;  %v2952_v27 = vstv %s2442_s4 }
  0x4c   : > { %3005 = vst [vmem:[#allocation16_spill] sm:$0xff] %v2451_v2  ;;  %v1322_v18 = vadd.f32 %v1306_v60, %v1284_v43  ;;  %v1323_v56 = vadd.f32 %v1307_v33, %v1285_v13  ;;  %v2461_v24 = vmul.f32 %v2952_v27, %v445_v62  ;;  %v469_v12 = vadd.s32 8, %v2025_v3  ;;  %v2475_v33 = vld [vmem:[%s2047_s23 + $0x8] sm:$0xff]  ;;  %v2478_v62 = vld [vmem:[%s2047_s23 + $0x20] sm:$0xff] }
  0x4d   : > { %1720 = vmatprep.mubr.msk.bf16.mxu1 %vm1376_vm10, %v1364_v34  ;;  %v470_v29 = vadd.s32 16, %v2025_v3  ;;  %v471_v30 = vadd.s32 24, %v2025_v3  ;;  %v472_v1 = vadd.s32 32, %v2025_v3  ;;  %v473_v52 = vadd.s32 40, %v2025_v3 }
  0x4e   : > { %v1338_v36 = vmax.f32 %v1322_v18, 0.0  ;;  %v1339_v38 = vmax.f32 %v1323_v56, 0.0  ;;  %v474_v47 = vadd.s32 48, %v2025_v3  ;;  %v492_v42 = vand.u32 15, %v2025_v3 }
  0x4f   : > { %v499_v57 = vand.u32 15, %v469_v12  ;;  %v506_v55 = vand.u32 15, %v470_v29  ;;  %v513_v58 = vand.u32 15, %v471_v30  ;;  %v520_v49 = vand.u32 15, %v472_v1  ;;  %v2494_v29 = vld [vmem:[%s2047_s23 + $0x10] sm:$0xff]  ;;  %v2497_v30 = vld [vmem:[%s2047_s23 + $0x18] sm:$0xff] }
  0x50   : > { %v1354_v28 = vmin.f32 %v1338_v36, 6.0  ;;  %v1355_v60 = vmin.f32 %v1339_v38, 6.0  ;;  %v527_v43 = vand.u32 15, %v473_v52  ;;  %v534_v13 = vand.u32 15, %v474_v47 }
  0x51   : > { %vm2480_vm12 = vcmp.eq.s32.totalorder %v492_v42, 0  ;;  %vm2484_vm13 = vcmp.eq.s32.totalorder %v506_v55, 0  ;;  %vm2488_vm14 = vcmp.eq.s32.totalorder %v520_v49, 0  ;;  %v748_v56 = vrot.slane %v2454_v16, 7 }
  0x52   : > { %v1365_v12 = vpack.c.bf16 %v1355_v60, %v1354_v28  ;;  %vm2499_vm15 = vcmp.eq.s32.totalorder %v534_v13, 0  ;;  %v749_v52 = vrot.slane %v2456_v7, 7  ;;  %v750_v36 = vrot.slane %v2472_v50, 7 }
  0x53   : > { %v751_v38 = vrot.slane %v2475_v33, 7  ;;  %v752_v47 = vrot.slane %v2494_v29, 7  ;;  %v753_v42 = vrot.slane %v2497_v30, 7  ;;  %v754_v55 = vrot.slane %v2478_v62, 7 }
  0x54   : > { %1721 = vmatmul.mubr.msk.bf16.vlgmr.msra.gmra.mrb[0].mxu1 %vm1376_vm10, %v1365_v12  ;;  %v2953_v49 = vrot.slane %v2461_v24, 7  ;;  %v786_v28 = vsel %vm768_vm1, %v749_v52, %v750_v36  ;;  %v787_v60 = vsel %vm768_vm1, %v748_v56, %v749_v52  ;;  %vm2515_vm0 = vcmp.eq.s32.totalorder %v499_v57, 15 }
  0x55   : > { %v2523_v61 = vsel %vm768_vm1, %v754_v55, %v755_v31  ;;  %v782_v12 = vsel %vm768_vm1, %v753_v42, %v754_v55  ;;  %v2529_v44 = vsel %vm768_vm1, %v752_v47, %v753_v42  ;;  %v784_v52 = vsel %vm768_vm1, %v751_v38, %v752_v47 }
  0x56   : > { %v2535_v57 = vsel %vm768_vm1, %v750_v36, %v751_v38  ;;  %v788_v31 = vsel %vm768_vm1, %v2953_v49, %v748_v56  ;;  %v2543_v27 = vsel %vm2484_vm13, 0.0, %v786_v28  ;;  %v2547_v42 = vsel %vm2488_vm14, 0.0, %v784_v52 }
  0x57   : > { %v829_v47 = vsel %vm2480_vm12, 0.0, %v788_v31  ;;  %v2553_v36 = vsel %vm2499_vm15, 0.0, %v782_v12  ;;  %vm2555_vm3 = vcmp.eq.s32.totalorder %v513_v58, 15  ;;  %vm2559_vm4 = vcmp.eq.s32.totalorder %v527_v43, 15 }
  0x58   : > { %v2957_v34 = vrot.slane %v2454_v16, 1  ;;  %v870_v18 = vrot.slane %v2456_v7, 1  ;;  %v871_v55 = vrot.slane %v2472_v50, 1  ;;  %v872_v4 = vrot.slane %v2475_v33, 1 }
  0x59   : > { %v873_v1 = vrot.slane %v2494_v29, 1  ;;  %v874_v28 = vrot.slane %v2497_v30, 1  ;;  %v2958_v58 = vrot.slane %v2478_v62, 1  ;;  %v986_v43 = vmul.f32 %v2053_v19, %v2472_v50 }
  0x5a   : > { %v2574_v12 = vsel %vm889_vm2, %v871_v55, %v872_v4  ;;  %v907_v52 = vsel %vm889_vm2, %v870_v18, %v871_v55  ;;  %v908_v31 = vsel %vm889_vm2, %v2957_v34, %v870_v18  ;;  %v987_v49 = vmul.f32 %v2053_v19, %v2475_v33 }
  0x5b   : > { %v903_v59 = vsel %vm889_vm2, %v874_v28, %v2958_v58  ;;  %v2590_v15 = vsel %vm889_vm2, %v873_v1, %v874_v28  ;;  %v905_v55 = vsel %vm889_vm2, %v872_v4, %v873_v1  ;;  %v951_v6 = vsel %vm2515_vm0, 0.0, %v907_v52 }
  0x5c   : > { %v953_v18 = vsel %vm2555_vm3, 0.0, %v905_v55  ;;  %v2600_v34 = vsel %vm2559_vm4, 0.0, %v903_v59  ;;  %v988_v58 = vmul.f32 %v2053_v19, %v2494_v29  ;;  %v989_v28 = vmul.f32 %v2053_v19, %v2497_v30 }
  0x5d   : > { %v990_v26 = vmul.f32 %v2053_v19, %v2478_v62  ;;  %v991_v13 = vmul.f32 %v2053_v19, %v2056_v20  ;;  %v1008_v4 = vadd.f32 %v2208_v10, %v986_v43  ;;  %v1009_v38 = vadd.f32 %v2208_v10, %v987_v49 }
  0x5e   : > { %v1010_v56 = vadd.f32 %v2208_v10, %v988_v58  ;;  %v1011_v59 = vadd.f32 %v2208_v10, %v989_v28  ;;  %v1030_v1 = vmul.f32 %v2203_v9, %v829_v47  ;;  %v1031_v52 = vmul.f32 %v2203_v9, %v787_v60 }
  0x5f   : > { %v1012_v55 = vadd.f32 %v2208_v10, %v990_v26  ;;  %v1013_v51 = vadd.f32 %v2208_v10, %v991_v13  ;;  %v1032_v54 = vmul.f32 %v2203_v9, %v2543_v27  ;;  %v1033_v43 = vmul.f32 %v2203_v9, %v2535_v57 }
  0x60   : > { %v1034_v49 = vmul.f32 %v2203_v9, %v2547_v42  ;;  %v1035_v58 = vmul.f32 %v2203_v9, %v2529_v44  ;;  %v2628_v47 = vmul.f32 %v2203_v9, %v2553_v36  ;;  %v2632_v26 = vmul.f32 %v2203_v9, %v2523_v61 }
  0x61   : > { %v1046_v60 = vadd.f32 %v1030_v1, %v1008_v4  ;;  %v1047_v28 = vadd.f32 %v1031_v52, %v1009_v38  ;;  %v1048_v13 = vadd.f32 %v1032_v54, %v1010_v56  ;;  %v1049_v14 = vadd.f32 %v1033_v43, %v1011_v59 }
  0x62   : > { %v1050_v8 = vadd.f32 %v1034_v49, %v1012_v55  ;;  %v1051_v46 = vadd.f32 %v1035_v58, %v1013_v51  ;;  %v1068_v53 = vmul.f32 %v2042_v11, %v2454_v16  ;;  %v1069_v39 = vmul.f32 %v2042_v11, %v2456_v7 }
  0x63   : > { %v1070_v2 = vmul.f32 %v2042_v11, %v2472_v50  ;;  %v1071_v48 = vmul.f32 %v2042_v11, %v2475_v33  ;;  %v1072_v9 = vmul.f32 %v2042_v11, %v2494_v29  ;;  %v1073_v54 = vmul.f32 %v2042_v11, %v2497_v30 }
  0x64   : > { %v1084_v4 = vadd.f32 %v1068_v53, %v1046_v60  ;;  %v1085_v51 = vadd.f32 %v1069_v39, %v1047_v28  ;;  %v1106_v38 = vmul.f32 %v2268_v45, %v908_v31  ;;  %v1107_v56 = vmul.f32 %v2268_v45, %v951_v6 }
  0x65   : > { %v1086_v59 = vadd.f32 %v1070_v2, %v1048_v13  ;;  %v1087_v7 = vadd.f32 %v1071_v48, %v1049_v14  ;;  %v1088_v1 = vadd.f32 %v1072_v9, %v1050_v8  ;;  %v1089_v52 = vadd.f32 %v1073_v54, %v1051_v46 }
  0x66   : > { %v1108_v50 = vmul.f32 %v2268_v45, %v2574_v12  ;;  %v1109_v33 = vmul.f32 %v2268_v45, %v953_v18  ;;  %v1110_v55 = vmul.f32 %v2268_v45, %v2590_v15  ;;  %v1111_v53 = vmul.f32 %v2268_v45, %v2600_v34 }
  0x67   : > { %v1122_v39 = vadd.f32 %v1106_v38, %v1084_v4  ;;  %v1123_v43 = vadd.f32 %v1107_v56, %v1085_v51  ;;  %v1144_v6 = vmul.f32 %v2291_v5, %v2543_v27  ;;  %v1145_v8 = vmul.f32 %v2291_v5, %v2535_v57 }
  0x68   : > { %v1124_v46 = vadd.f32 %v1108_v50, %v1086_v59  ;;  %v1125_v14 = vadd.f32 %v1109_v33, %v1087_v7  ;;  %v1126_v48 = vadd.f32 %v1110_v55, %v1088_v1  ;;  %v1127_v2 = vadd.f32 %v1111_v53, %v1089_v52 }
  0x69   : > { %v1146_v31 = vmul.f32 %v2291_v5, %v2547_v42  ;;  %v1147_v49 = vmul.f32 %v2291_v5, %v2529_v44  ;;  %v1148_v58 = vmul.f32 %v2291_v5, %v2553_v36  ;;  %v1149_v60 = vmul.f32 %v2291_v5, %v2523_v61 }
  0x6a   : > { %v1160_v27 = vadd.f32 %v1144_v6, %v1122_v39  ;;  %v1161_v28 = vadd.f32 %v1145_v8, %v1123_v43  ;;  %v1182_v57 = vmul.f32 %v2321_v37, %v2574_v12  ;;  %v1183_v13 = vmul.f32 %v2321_v37, %v953_v18 }
  0x6b   : > { %v1162_v9 = vadd.f32 %v1146_v31, %v1124_v46  ;;  %v1163_v54 = vadd.f32 %v1147_v49, %v1125_v14  ;;  %v2670_v4 = vadd.f32 %v1148_v58, %v1126_v48  ;;  %v2672_v51 = vadd.f32 %v1149_v60, %v1127_v2 }
  0x6c   : > { %v1184_v38 = vmul.f32 %v2321_v37, %v2590_v15  ;;  %v1185_v56 = vmul.f32 %v2321_v37, %v2600_v34  ;;  %v1198_v59 = vadd.f32 %v1182_v57, %v1160_v27  ;;  %v1199_v7 = vadd.f32 %v1183_v13, %v1161_v28 }
  0x6d   : > { %v1220_v1 = vmul.f32 %v2344_v63, %v2547_v42  ;;  %v1221_v12 = vmul.f32 %v2344_v63, %v2529_v44  ;;  %v1258_v18 = vmul.f32 %v2349_v0, %v2494_v29  ;;  %v1259_v52 = vmul.f32 %v2349_v0, %v2497_v30 }
  0x6e   : > { %v1200_v50 = vadd.f32 %v1184_v38, %v1162_v9  ;;  %v1201_v33 = vadd.f32 %v1185_v56, %v1163_v54  ;;  %v1296_v55 = vmul.f32 %v2364_v17, %v2590_v15  ;;  %v1297_v53 = vmul.f32 %v2364_v17, %v2600_v34 }
  0x6f   : > { %v1236_v39 = vadd.f32 %v1220_v1, %v1198_v59  ;;  %v1237_v43 = vadd.f32 %v1221_v12, %v1199_v7  ;;  %v475_v42 = vadd.s32 56, %v2025_v3  ;;  %v876_v44 = vrot.slane %v2056_v20, 1 }
  0x70   : > { %v992_v29 = vmul.f32 %v2053_v19, %v2059_v21  ;;  %v993_v30 = vmul.f32 %v2053_v19, %v2062_v22  ;;  %v1074_v6 = vmul.f32 %v2042_v11, %v2478_v62  ;;  %v1075_v15 = vmul.f32 %v2042_v11, %v2056_v20 }
  0x71   : > { %v1274_v8 = vadd.f32 %v1258_v18, %v1236_v39  ;;  %v1275_v34 = vadd.f32 %v1259_v52, %v1237_v43  ;;  %v541_v46 = vand.u32 15, %v475_v42  ;;  %v3020_v14 = vrot.slane %v2059_v21, 1  ;;  %v444_v52 = vld [vmem:[%s2432_s1] sm:$0xff]  ;;  %s2888_s1 = scalar_lea.sflag [#allocation3], %s386_s27 }
  0x72   : > { %v3021_v2 = vrot.slane %v2478_v62, 1  ;;  %v1014_v49 = vadd.f32 %v2208_v10, %v992_v29  ;;  %v1015_v58 = vadd.f32 %v2208_v10, %v993_v30  ;;  %v1222_v60 = vmul.f32 %v2344_v63, %v2553_v36 }
  0x73   : > { %v901_v48 = vsel %vm889_vm2, %v876_v44, %v3020_v14  ;;  %v1312_v27 = vadd.f32 %v1296_v55, %v1274_v8  ;;  %v1313_v28 = vadd.f32 %v1297_v53, %v1275_v34  ;;  %vm856_vm5 = vcmp.eq.s32.totalorder %v541_v46, 15  ;;  %v466_v8 = vld [vmem:[%s2047_s23 + $0x78] sm:$0xff] }
  0x74   : > { %v902_v31 = vsel %vm889_vm2, %v3021_v2, %v876_v44  ;;  %v957_v13 = vsel %vm856_vm5, 0.0, %v901_v48  ;;  %v1052_v9 = vadd.f32 %v2628_v47, %v1014_v49  ;;  %v1053_v54 = vadd.f32 %v2632_v26, %v1015_v58 }
  0x75   : > { %v1112_v57 = vmul.f32 %v2268_v45, %v902_v31  ;;  %v2716_v38 = vmul.f32 %v2321_v37, %v902_v31  ;;  %v1328_v56 = vmax.f32 %v1312_v27, 0.0  ;;  %v1329_v59 = vmax.f32 %v1313_v28, 0.0 }
  0x76   : > { %v1113_v7 = vmul.f32 %v2268_v45, %v957_v13  ;;  %v2720_v36 = vmul.f32 %v2321_v37, %v957_v13  ;;  %v1090_v1 = vadd.f32 %v1074_v6, %v1052_v9  ;;  %v1091_v12 = vadd.f32 %v1075_v15, %v1053_v54 }
  0x77   : > { %v1223_v18 = vmul.f32 %v2344_v63, %v2523_v61  ;;  %v1238_v47 = vadd.f32 %v1222_v60, %v1200_v50  ;;  %v1344_v26 = vmin.f32 %v1328_v56, 6.0  ;;  %v1345_v55 = vmin.f32 %v1329_v59, 6.0 }
  0x78   : > { %v1260_v53 = vmul.f32 %v2349_v0, %v2478_v62  ;;  %v1261_v45 = vmul.f32 %v2349_v0, %v2056_v20  ;;  %v2729_v39 = vadd.f32 %v1112_v57, %v1090_v1  ;;  %v2731_v43 = vadd.f32 %v1113_v7, %v1091_v12 }
  0x79   : > { %v1239_v42 = vadd.f32 %v1223_v18, %v1201_v33  ;;  %v1298_v44 = vmul.f32 %v2364_v17, %v902_v31  ;;  %v1360_v29 = vpack.c.bf16 %v1345_v55, %v1344_v26  ;;  %v1299_v50 = vmul.f32 %v2364_v17, %v957_v13 }
  0x7a   : > { %v1276_v61 = vadd.f32 %v1260_v53, %v1238_v47  ;;  %v3022_v30 = vstv %s2442_s4  ;;  %v484_v62 = vadd.s32 128, %v2025_v3  ;;  %v485_v20 = vadd.s32 136, %v2025_v3 }
  0x7b   : > { %v2737_v6 = vmul.f32 %v3022_v30, %v444_v52  ;;  %v1277_v15 = vadd.f32 %v1261_v45, %v1239_v42  ;;  %v764_v34 = vrot.slane %v2383_v41, 7  ;;  %1712 = vmatprep.mubr.msk.bf16.mxu0 %vm1376_vm10, %v1360_v29  ;;  %v765_v46 = vrot.slane %v466_v8, 7 }
  0x7c   : > { %v1314_v33 = vadd.f32 %v1298_v44, %v1276_v61  ;;  %v886_v14 = vrot.slane %v466_v8, 1  ;;  %v604_v31 = vand.u32 15, %v484_v62  ;;  %v611_v49 = vand.u32 15, %v485_v20  ;;  %v3025_v20 = vld [vmem:[#allocation14_spill] sm:$0xff] }
  0x7d   : > { %v887_v48 = vrot.slane %v2737_v6, 1  ;;  %v1315_v2 = vadd.f32 %v1299_v50, %v1277_v15  ;;  %v3023_v58 = vrot.slane %v2105_v35, 7  ;;  %v771_v28 = vsel %vm768_vm1, %v764_v34, %v765_v46 }
  0x7e   : > { %v1330_v27 = vmax.f32 %v1314_v33, 0.0  ;;  %v3024_v13 = vrot.slane %v2383_v41, 1  ;;  %vm744_vm6 = vcmp.eq.s32.totalorder %v604_v31, 0  ;;  %vm866_vm7 = vcmp.eq.s32.totalorder %v611_v49, 15 }
  0x7f   : > { %v772_v60 = vsel %vm768_vm1, %v3023_v58, %v764_v34  ;;  %v891_v57 = vsel %vm889_vm2, %v886_v14, %v887_v48  ;;  %v1331_v54 = vmax.f32 %v1315_v2, 0.0  ;;  %v1001_v56 = vmul.f32 %v2053_v19, %v466_v8 }
  0x80   : > { %v892_v9 = vsel %vm889_vm2, %v3024_v13, %v886_v14  ;;  %v1346_v59 = vmin.f32 %v1330_v27, 6.0  ;;  %v845_v7 = vsel %vm744_vm6, 0.0, %v772_v60  ;;  %v967_v1 = vsel %vm866_vm7, 0.0, %v891_v57 }
  0x81   : > { %v1159_v12 = vmul.f32 %v2291_v5, %v771_v28  ;;  %v1347_v18 = vmin.f32 %v1331_v54, 6.0  ;;  %v1023_v47 = vadd.f32 %v2208_v10, %v1001_v56  ;;  %v1158_v52 = vmul.f32 %v2291_v5, %v845_v7  ;;  %v3030_v54 = vld [vmem:[#allocation16_spill] sm:$0xff] }
  0x82   : > { %v1196_v26 = vmul.f32 %v2321_v37, %v892_v9  ;;  %v1197_v55 = vmul.f32 %v2321_v37, %v967_v1  ;;  %v1210_v53 = vadd.f32 %v2427_v32, %v2366_v23  ;;  %v1211_v19 = vadd.f32 %v2438_v40, %v2370_v25 }
  0x83   : > { %v1232_v45 = vmul.f32 %v2344_v63, %v845_v7  ;;  %v1361_v42 = vpack.c.bf16 %v1347_v18, %v1346_v59  ;;  %v1233_v44 = vmul.f32 %v2344_v63, %v771_v28  ;;  %v1270_v10 = vmul.f32 %v2349_v0, %v2383_v41 }
  0x84   : > { %v1271_v29 = vmul.f32 %v2349_v0, %v466_v8  ;;  %v1308_v50 = vmul.f32 %v2364_v17, %v892_v9  ;;  %v1309_v30 = vmul.f32 %v2364_v17, %v967_v1  ;;  %v486_v23 = vadd.s32 144, %v2025_v3 }
  0x85   : > { %v1248_v61 = vadd.f32 %v1232_v45, %v1210_v53  ;;  %1713 = vmatmul.mubr.msk.bf16.vlgmr.msra.gmra.mrb[0].mxu0 %vm1376_vm10, %v1361_v42  ;;  %v1249_v25 = vadd.f32 %v1233_v44, %v1211_v19  ;;  %v487_v32 = vadd.s32 152, %v2025_v3  ;;  %v766_v40 = vrot.slane %v2737_v6, 7 }
  0x86   : > { %v888_v15 = vrot.slane %v2461_v24, 1  ;;  %v618_v41 = vand.u32 15, %v486_v23  ;;  %v1061_v8 = vadd.f32 %v3025_v20, %v1023_v47  ;;  %v1083_v34 = vmul.f32 %v2042_v11, %v2105_v35 }
  0x87   : > { %v1286_v62 = vadd.f32 %v1270_v10, %v1248_v61  ;;  %v1287_v33 = vadd.f32 %v1271_v29, %v1249_v25  ;;  %v625_v14 = vand.u32 15, %v487_v32  ;;  %v3026_v2 = vrot.slane %v2461_v24, 7  ;;  %v3032_v61 = vld [vmem:[#allocation8_spill] sm:$0xff]  ;;  %v3034_v32 = vld [vmem:[#allocation11_spill] sm:$0xff] }
  0x88   : > { %v770_v49 = vsel %vm768_vm1, %v765_v46, %v766_v40  ;;  %vm746_vm8 = vcmp.eq.s32.totalorder %v618_v41, 0  ;;  %v890_v60 = vsel %vm889_vm2, %v887_v48, %v888_v15  ;;  %v3027_v27 = vrot.slane %v2454_v16, 1  ;;  %v3031_v16 = vld [vmem:[#allocation15_spill] sm:$0xff] }
  0x89   : > { %v769_v31 = vsel %vm768_vm1, %v766_v40, %v3026_v2  ;;  %v1324_v58 = vadd.f32 %v1308_v50, %v1286_v62  ;;  %v1325_v35 = vadd.f32 %v1309_v30, %v1287_v33  ;;  %v847_v28 = vsel %vm746_vm8, 0.0, %v770_v49  ;;  %v3035_v40 = vld [vmem:[#allocation12_spill] sm:$0xff] }
  0x8a   : > { %v909_v11 = vsel %vm889_vm2, %v888_v15, %v3027_v27  ;;  %vm2794_vm9 = vcmp.eq.s32.totalorder %v625_v14, 15  ;;  %v1099_v13 = vadd.f32 %v1083_v34, %v1061_v8  ;;  %v1174_v56 = vadd.f32 %v1158_v52, %v3030_v54 }
  0x8b   : > { %v1340_v9 = vmax.f32 %v1324_v58, 0.0  ;;  %v969_v46 = vsel %vm2794_vm9, 0.0, %v909_v11  ;;  %v1234_v48 = vmul.f32 %v2344_v63, %v847_v28  ;;  %v1341_v59 = vmax.f32 %v1325_v35, 0.0  ;;  %v3036_v58 = vld [vmem:[#allocation9_spill] sm:$0xff]  ;;  %v3037_v35 = vld [vmem:[#allocation7_spill] sm:$0xff] }
  0x8c   : > { %v1137_v7 = vadd.f32 %v3031_v16, %v1099_v13  ;;  %v1235_v3 = vmul.f32 %v2344_v63, %v769_v31  ;;  %v1272_v1 = vmul.f32 %v2349_v0, %v2737_v6  ;;  %v1212_v47 = vadd.f32 %v1196_v26, %v1174_v56  ;;  %v3033_v26 = vld [vmem:[#allocation6_spill] sm:$0xff] }
  0x8d   : > { %v1356_v18 = vmin.f32 %v1340_v9, 6.0  ;;  %v1273_v53 = vmul.f32 %v2349_v0, %v2461_v24  ;;  %v1310_v19 = vmul.f32 %v2364_v17, %v890_v60  ;;  %v1357_v45 = vmin.f32 %v1341_v59, 6.0  ;;  %v1805_v56 = vld [vmem:[%s2047_s23 + $0x48] sm:$0xff]  ;;  %s1663_s23 = sshll.u32 %s386_s27, 7 }
  0x8e   : > { %v1175_v42 = vadd.f32 %v1159_v12, %v1137_v7  ;;  %v1311_v52 = vmul.f32 %v2364_v17, %v969_v46  ;;  %v1202_v44 = vadd.f32 %v2716_v38, %v2670_v4  ;;  %v1250_v10 = vadd.f32 %v1234_v48, %v1212_v47  ;;  %v3039_v7 = vld [vmem:[#allocation10_spill] sm:$0xff]  ;;  %s2858_s13 = scalar_lea.vmem [#allocation2], %s1663_s23  ;;  %s1902_s23 = smov [#allocation2]  }
  0x8f   : > { %v1203_v29 = vadd.f32 %v2720_v36, %v2672_v51  ;;  %v1224_v6 = vmul.f32 %v2344_v63, %v3032_v61  ;;  %v1225_v50 = vmul.f32 %v2344_v63, %v3033_v26  ;;  %v1366_v24 = vpack.c.bf16 %v1357_v45, %v1356_v18  ;;  %s1534_s28 = sshll.u32 %s2858_s13, 4  ;;  %s1810_s10 = sshll.u32 %s1902_s23, 4  ;;  %s2881_s28 = int_to_ptr.vmem [resolvable:$true] %s1534_s28  ;;  %s1811_s10 = int_to_ptr.vmem [resolvable:$false] %s1810_s10 }
  0x90   : > { %v1213_v30 = vadd.f32 %v1197_v55, %v1175_v42  ;;  %v1262_v12 = vmul.f32 %v2349_v0, %v2059_v21  ;;  %v1263_v23 = vmul.f32 %v2349_v0, %v2062_v22  ;;  %v1288_v25 = vadd.f32 %v1272_v1, %v1250_v10  ;;  %v3040_v1 = vld [vmem:[#allocation13_spill] sm:$0xff]  ;;  %s1806_s4 = scalar_lea.vmem %s2881_s28, 2048  ;;  %s1812_s18 = scalar_lea.vmem %s1811_s10, 4096 }
  0x91   : > { %v1240_v4 = vadd.f32 %v1224_v6, %v1202_v44  ;;  %v1241_v38 = vadd.f32 %v1225_v50, %v1203_v29  ;;  %v1300_v51 = vmul.f32 %v2364_v17, %v3034_v32  ;;  %1724 = vmatprep.mubr.msk.bf16.mxu1 %vm1376_vm10, %v1366_v24  ;;  %v1301_v15 = vmul.f32 %v2364_v17, %v3035_v40  ;;  %p1807_p7 = scmp.ne.s32.totalorder %s2881_s28, %s1806_s4  ;;  %p1813_p11 = scmp.lt.s32.totalorder %s2881_s28, %s1811_s10 }
  0x92   : > { %v1251_v36 = vadd.f32 %v1235_v3, %v1213_v30  ;;  %v1150_v55 = vmul.f32 %v2291_v5, %v3032_v61  ;;  %v1151_v21 = vmul.f32 %v2291_v5, %v3033_v26  ;;  %v1326_v62 = vadd.f32 %v1310_v19, %v1288_v25  ;;  %p1814_p12 = scmp.lt.s32.totalorder %s1812_s18, %s1806_s4 }
  0x93   : > { %v1278_v22 = vadd.f32 %v1262_v12, %v1240_v4  ;;  %v1279_v41 = vadd.f32 %v1263_v23, %v1241_v38  ;;  %v1188_v20 = vmul.f32 %v2321_v37, %v3034_v32  ;;  %v1189_v14 = vmul.f32 %v2321_v37, %v3035_v40  ;;  %p1808_p9 = pnand %p1807_p7, %p1996_p3 }
  0x94   : > { %v1289_v8 = vadd.f32 %v1273_v53, %v1251_v36  ;;  %v1166_v34 = vadd.f32 %v1150_v55, %v2729_v39  ;;  %v1167_v33 = vadd.f32 %v1151_v21, %v2731_v43  ;;  %v1342_v2 = vmax.f32 %v1326_v62, 0.0  ;;  %v3038_v43 = vld [vmem:[#allocation5_spill] sm:$0xff]  ;;  %p1815_p13 = por %p1814_p12, %p1813_p11 }
  0x95   : > { %v1316_v31 = vadd.f32 %v1300_v51, %v1278_v22  ;;  %v1317_v49 = vadd.f32 %v1301_v15, %v1279_v41  ;;  %v1226_v5 = vmul.f32 %v2344_v63, %v3036_v58  ;;  %v1227_v28 = vmul.f32 %v2344_v63, %v3037_v35  ;;  %p1809_p10 = pneg %p1808_p9 }
  0x96   : > { %v1327_v60 = vadd.f32 %v1311_v52, %v1289_v8  ;;  %v1204_v27 = vadd.f32 %v1188_v20, %v1166_v34  ;;  %v1205_v11 = vadd.f32 %v1189_v14, %v1167_v33  ;;  %v1358_v57 = vmin.f32 %v1342_v2, 6.0 }
  0x97   : > { %v1332_v39 = vmax.f32 %v1316_v31, 0.0  ;;  %v1333_v13 = vmax.f32 %v1317_v49, 0.0  ;;  %v1264_v9 = vmul.f32 %v2349_v0, %v3038_v43  ;;  %v1265_v48 = vmul.f32 %v1805_v56, %v2349_v0  ;;  %p1816_p0 = pnand %p1815_p13, %p1809_p10 }
  0x98   : > { %v1343_v37 = vmax.f32 %v1327_v60, 0.0  ;;  %v1242_v46 = vadd.f32 %v1226_v5, %v1204_v27  ;;  %v1243_v54 = vadd.f32 %v1227_v28, %v1205_v11  ;;  %v1302_v3 = vmul.f32 %v2364_v17, %v3039_v7 }
  0x99   : > { %v1348_v59 = vmin.f32 %v1332_v39, 6.0  ;;  %v1349_v16 = vmin.f32 %v1333_v13, 6.0  ;;  %v1303_v63 = vmul.f32 %v2364_v17, %v3040_v1  ;;  %v1686_v17 = vld [vmem:[%s2946_s6] ss:$0 sm:$0xff] }
  0x9a   : > { %v1359_v18 = vmin.f32 %v1343_v37, 6.0  ;;  %v1280_v47 = vadd.f32 %v1264_v9, %v1242_v46  ;;  %v1281_v53 = vadd.f32 %v1265_v48, %v1243_v54 }
  0x9b   : > { %v1362_v19 = vpack.c.bf16 %v1349_v16, %v1348_v59 }
  0x9c   : > { %v1367_v45 = vpack.c.bf16 %v1359_v18, %v1358_v57  ;;  %v1318_v42 = vadd.f32 %v1302_v3, %v1280_v47  ;;  %v1319_v52 = vadd.f32 %v1303_v63, %v1281_v53 }
  0x9d   : > { %1716 = vmatprep.mubr.msk.bf16.mxu0 %vm1376_vm10, %v1362_v19 }
  0x9e   : > { %1725 = vmatmul.mubr.msk.bf16.gmra.mrb[4].mxu1 %vm1376_vm10, %v1367_v45  ;;  %v1334_v0 = vmax.f32 %v1318_v42, 0.0  ;;  %v1335_v44 = vmax.f32 %v1319_v52, 0.0 }
  0xa0   : > { %v1350_v10 = vmin.f32 %v1334_v0, 6.0  ;;  %v1351_v29 = vmin.f32 %v1335_v44, 6.0 }
  0xa2   : > { %v1363_v61 = vpack.c.bf16 %v1351_v29, %v1350_v10 }
  0xa4   : > { %1717 = vmatmul.mubr.msk.bf16.gmra.mrb[4].mxu0 %vm1376_vm10, %v1363_v61 }
 0x127   : > { %v1722_v6 = vpop.f32.mrb[0].mxu1 }
 0x128   : > { %v1480_v26 = vadd.f32 %v1722_v6, %v1686_v17  ;;  %v1471_v50 = vpop.f32.mrb[1].mxu1 }
 0x129   : > { %v1472_v24 = vadd.f32 %v1686_v17, %v1471_v50  ;;  %v1723_v30 = vpop.f32.mrb[2].mxu1 }
 0x12a   : > { %1512 = vst [vmem:[%s2858_s13 + $0x50] sm:$0xff] %v1480_v26  ;;  %v1483_v12 = vadd.f32 %v1723_v30, %v1686_v17  ;;  %v1474_v23 = vpop.f32.mrb[3].mxu1 }
 0x12b   : > { %1510 = vst [vmem:[%s2858_s13 + $0x40] sm:$0xff] %v1472_v24  ;;  %v1475_v25 = vadd.f32 %v1686_v17, %v1474_v23 }
 0x12c   : > { %1513 = vst [vmem:[%s2858_s13 + $0x58] sm:$0xff] %v1483_v12 }
 0x12d   : > { %1511 = vst [vmem:[%s2858_s13 + $0x48] sm:$0xff] %v1475_v25 }
 0x158   : > { %v1714_v4 = vpop.f32.mrb[0].mxu0 }
 0x159   : > { %v1448_v38 = vadd.f32 %v1714_v4, %v1686_v17  ;;  %v1439_v32 = vpop.f32.mrb[1].mxu0 }
 0x15a   : > { %v1440_v51 = vadd.f32 %v1686_v17, %v1439_v32  ;;  %v1715_v36 = vpop.f32.mrb[2].mxu0 }
 0x15b   : > { %1504 = vst [vmem:[%s2858_s13 + $0x10] sm:$0xff] %v1448_v38  ;;  %v1451_v40 = vadd.f32 %v1715_v36, %v1686_v17  ;;  %v1442_v15 = vpop.f32.mrb[3].mxu0 }
 0x15c   : > { %1502 = vst [vmem:[%s2858_s13] sm:$0xff] %v1440_v51  ;;  %v1443_v55 = vadd.f32 %v1686_v17, %v1442_v15 }
 0x15d   : > { %1505 = vst [vmem:[%s2858_s13 + $0x18] sm:$0xff] %v1451_v40 }
 0x15e   : > { %1503 = vst [vmem:[%s2858_s13 + $0x8] sm:$0xff] %v1443_v55 }
 0x171   : > { %v1726_v21 = vpop.f32.mrb[4].mxu1 }
 0x172   : > { %v1496_v62 = vadd.f32 %v1726_v21, %v1686_v17  ;;  %v1487_v22 = vpop.f32.mrb[5].mxu1 }
 0x173   : > { %v1488_v41 = vadd.f32 %v1686_v17, %v1487_v22  ;;  %v1727_v20 = vpop.f32.mrb[6].mxu1 }
 0x174   : > { %1516 = vst [vmem:[%s2858_s13 + $0x70] sm:$0xff] %v1496_v62  ;;  %v1499_v8 = vadd.f32 %v1727_v20, %v1686_v17  ;;  %v1490_v34 = vpop.f32.mrb[7].mxu1 }
 0x175   : > { %1514 = vst [vmem:[%s2858_s13 + $0x60] sm:$0xff] %v1488_v41  ;;  %v1491_v33 = vadd.f32 %v1686_v17, %v1490_v34 }
 0x176   : > { %1517 = vst [vmem:[%s2858_s13 + $0x78] sm:$0xff] %v1499_v8 }
 0x177   : > { %v1718_v14 = vpop.f32.mrb[4].mxu0  ;;  %1515 = vst [vmem:[%s2858_s13 + $0x68] sm:$0xff] %v1491_v33 }
 0x178   : > { %v1464_v2 = vadd.f32 %v1718_v14, %v1686_v17  ;;  %v1455_v31 = vpop.f32.mrb[5].mxu0 }
 0x179   : > { %v1456_v49 = vadd.f32 %v1686_v17, %v1455_v31  ;;  %v1719_v58 = vpop.f32.mrb[6].mxu0 }
 0x17a   : > { %1508 = vst [vmem:[%s2858_s13 + $0x30] sm:$0xff] %v1464_v2  ;;  %v1467_v5 = vadd.f32 %v1719_v58, %v1686_v17  ;;  %v1458_v60 = vpop.f32.mrb[7].mxu0 }
 0x17b   : > { %1506 = vst [vmem:[%s2858_s13 + $0x20] sm:$0xff] %v1456_v49  ;;  %v1459_v27 = vadd.f32 %v1686_v17, %v1458_v60 }
 0x17c   : > { %1509 = vst [vmem:[%s2858_s13 + $0x38] sm:$0xff] %v1467_v5 }
 0x17d   : > { %1507 = vst [vmem:[%s2858_s13 + $0x28] sm:$0xff] %v1459_v27 }
 0x17e   : > { %1819 = shalt.err (!%p1816_p0)
}
 0x17f   : > { %s1820_s27 = scalar_lea.hbm %s2878_s20, 2048  ;;  %s1824_s16 = scalar_lea.hbm %s2947_s7, 8192 }
 0x180   : > { %p1821_p1 = scmp.ne.s32.totalorder %s2878_s20, %s1820_s27  ;;  %p1825_p5 = scmp.lt.u32.totalorder %s2878_s20, %s2947_s7 }
 0x181   : > { %p1826_p6 = scmp.lt.u32.totalorder %s1824_s16, %s1820_s27  ;;  %p1828_p9 = scmp.lt.u32.totalorder %s1820_s27, %s2878_s20 }
 0x182   : > { %p1822_p2 = pnand %p1821_p1, %p1996_p3 }
 0x183   : > { %p1827_p7 = por %p1826_p6, %p1825_p5 }
 0x184   : > { %p1823_p4 = pneg %p1822_p2 }
 0x185   : > { %p1829_p10 = por %p1828_p9, %p1827_p7 }
 0x187   : > { %p1830_p11 = pnand %p1829_p10, %p1823_p4 }
 0x189   : > { %1833 = shalt.err (!%p1830_p11)
}
 0x18a   : > { %s1903_s9 = smov 128   ;;  %s1904_s4 = smov 8  }
 0x18b   : > { %1732 = dma.vmem_to_hbm [thread:$0]  (%p1996_p3), %s2881_s28, 2048, %s2878_s20, %s2888_s1, %s1903_s9, %s1903_s9, %s1904_s4  }
 0x18c PF: > { %p1738_p12 = scmp.ge.s32.totalorder %s1900_s8, 2  ;;  %s1549_s23 = sand.u32 1, %s1872_s24  }
 0x18d   : > { %s1550_s10 = scalar_lea.sflag [#allocation3], %s1549_s23 }
 0x18e   : > { %p1735_p13 = pnand %p1738_p12, %p2005_p8 }
 0x190   : > { %1867 = dma.done.wait (!%p1735_p13), %s1550_s10, 2048  }
 0x191   : > { %1869 = vsyncadd (!%p1735_p13), %s1550_s10, 4294965248  ;;  %s20_s8 = sadd.s32 1, %s1900_s8   ;;  %s3041_s24 = smov %s1876_s25 }
 0x192   : > { %p17_p0 = scmp.ge.s32.totalorder %s20_s8, 6   ;;  %s3042_s25 = smov %s1880_s26 }
 0x193   : > { %s3043_s26 = smov %s2014_s19  ;;  %s3044_s27 = smov %s1892_s29 }
 0x194   : > { %s3045_s28 = smov %s1896_s30  ;;  %s3046_s29 = smov %s3049_s11 }
 0x195   : > { %s3047_s30 = smov %s3053_s12  ;;  %19 = sbr.rel (!%p17_p0) target bundleno = 8 (0x8), region = 89 }
 0x19c   :  { %1555 = vsyncpa [#allocation3], 1 }
 0x19d   :  { %1557 = vsyncpa [#allocation3 + $0x1], 1 }

</bundles_post_ra>
